<compile_context>
chip_gen: v5e
topology: v5e:2x2
jax: 0.10.0
libtpu: 0.0.40
codegen_flags: <defaults>
</compile_context>

<pallas_src>
import functools

import jax
import jax.numpy as jnp
import numpy as np
from jax.experimental import pallas as pl
from jax.experimental.pallas import tpu as pltpu


def _round_up(v, m):
    return (v + m - 1) // m * m


def _flow_step_kernel(
    x_ref, u_ref,
    wcat_ref, bp_ref,
    inj_b1_ref, inj_w2_ref, inj_b2_ref,
    cpl_w1x_ref, cpl_b1_ref, cpl_w2_ref, cpl_b2_ref,
    x_out_ref, ldj_ref,
    acc_ref,
    *, c_x, c_half, hidden, rg, hg,
):
    t_idx = pl.program_id(2)
    n_t = pl.num_programs(2)

    # Elementwise ldj accumulator in VMEM scratch; reduction deferred to last tile.
    @pl.when(t_idx == 0)
    def _():
        acc_ref[...] = jnp.zeros_like(acc_ref)

    # ---- One fused first-layer matmul on the MXU (bf16 operands, f32 accum) ----
    #   rows [0, c_x)              : ActNorm folded into invertible 1x1 conv (wp @ x)
    #   rows [rg, rg+hidden)       : injection first layer (inj_w1 @ u)
    #   rows [rg+hg, rg+hg+hidden) : coupling u-branch      (cpl_w1u @ u)
    xu = jnp.concatenate(
        [x_ref[0].astype(jnp.float32), u_ref[0].astype(jnp.float32)], axis=0
    ).astype(jnp.bfloat16)
    out1 = jnp.dot(wcat_ref[...], xu, preferred_element_type=jnp.float32)

    y = out1[:c_x, :] + bp_ref[...]                 # post ActNorm + 1x1 conv (f32)
    hu_inj = out1[rg:rg + hidden, :]                # 8-aligned row-group starts
    hu_cpl = out1[rg + hg:rg + hg + hidden, :]

    # ---- Affine injection ----
    h1 = jnp.maximum(hu_inj + inj_b1_ref[...], 0.0)
    est = jnp.dot(inj_w2_ref[...], h1.astype(jnp.bfloat16),
                  preferred_element_type=jnp.float32) + inj_b2_ref[...]
    z1 = est[:c_x, :] + 2.0                         # scale rows (group starts at 0)
    e1 = jnp.exp(-jnp.abs(z1))                      # shared exp for sigmoid & log-sigmoid
    r1 = pl.reciprocal(1.0 + e1, approx=True)
    s1 = jnp.where(z1 >= 0.0, r1, e1 * r1)          # sigmoid(z1)
    # log(1+e) kept as plain log (log1p would be marginally more precise; cosmetic).
    log_s1 = jnp.minimum(z1, 0.0) - jnp.log(1.0 + e1)
    x2 = y * s1 + est[rg:rg + c_x, :]               # shift rows start at 8-aligned rg

    # ---- Affine coupling: full channel width, masked to the xb half ----
    # cpl_w1x is zero-padded to (hidden, c_x) in the wrapper, so no x[:c_half] slice.
    h2 = jnp.maximum(
        jnp.dot(cpl_w1x_ref[...], x2.astype(jnp.bfloat16),
                preferred_element_type=jnp.float32) + hu_cpl + cpl_b1_ref[...],
        0.0)
    est2 = jnp.dot(cpl_w2_ref[...], h2.astype(jnp.bfloat16),
                   preferred_element_type=jnp.float32) + cpl_b2_ref[...]
    z2 = est2[:c_x, :] + 2.0
    e2 = jnp.exp(-jnp.abs(z2))
    r2 = pl.reciprocal(1.0 + e2, approx=True)
    s2 = jnp.where(z2 >= 0.0, r2, e2 * r2)
    log_s2 = jnp.minimum(z2, 0.0) - jnp.log(1.0 + e2)

    in_b = jax.lax.broadcasted_iota(jnp.int32, x2.shape, 0) >= c_half
    x3 = jnp.where(in_b, x2 * s2 + est2[rg:rg + c_x, :], x2)

    # Single full-tile, lane-dense store (no split sublane-masked stores).
    x_out_ref[0, :, :] = x3.astype(x_out_ref.dtype)

    # Pure-VPU elementwise ldj accumulation per tile.
    acc_ref[...] = acc_ref[...] + log_s1 + jnp.where(in_b, log_s2, 0.0)

    @pl.when(t_idx == n_t - 1)
    def _():
        ldj_ref[...] = jnp.zeros_like(ldj_ref) + jnp.sum(acc_ref[...])


def _pick_tile(hw, bytes_per_col, budget_bytes=48 << 20):
    # Largest lane-aligned (multiple-of-128) tile dividing H*W whose
    # double-buffered in/out blocks stay well inside v7x's 64 MiB physical VMEM.
    for t in (4096, 2048, 1024, 512, 256, 128):
        if hw % t == 0 and 2 * bytes_per_col * t <= budget_bytes:
            return t
    return 128 if hw % 128 == 0 else hw


def flow_step_forward(x_nchw, u_nchw, params, tile_hw=None, hw_splits=None):
    """Forward flow of FlowStep. Returns (x_nchw_out, ldj[N])."""
    n, c_x, h, w = x_nchw.shape
    c_u = u_nchw.shape[1]
    hw = h * w
    c_half = c_x // 2
    c_rest = c_x - c_half
    hidden = params["inj_w1"].shape[0]
    rg = _round_up(c_x, 8)        # 8-aligned channel row-group
    hg = _round_up(hidden, 8)     # 8-aligned hidden row-group

    bytes_per_col = (2 * c_x + c_u) * x_nchw.dtype.itemsize
    t_hw = _pick_tile(hw, bytes_per_col) if tile_hw is None else tile_hw
    assert hw % t_hw == 0, "tile_hw must divide H*W"
    n_tiles = hw // t_hw
    if hw_splits is None:
        # v7x has 2 TensorCores; split HW when the batch alone can't fill them.
        hw_splits = 2 if (n < 2 and n_tiles % 2 == 0) else 1
    assert n_tiles % hw_splits == 0, "hw_splits must divide the HW tile count"
    tiles_per_split = n_tiles // hw_splits

    # NCHW -> (N, C, HW): free reshape, no transpose.
    x = x_nchw.reshape(n, c_x, hw)
    u = u_nchw.reshape(n, c_u, hw)

    # ---------- parameter-only precompute (constant w.r.t. data) ----------
    logs = params["an_logs"].astype(jnp.float32)          # (c_x,)
    bias = params["an_bias"].astype(jnp.float32)          # (c_x,)
    w_conv = params["w_conv"].astype(jnp.float32)         # (c_x, c_x)
    wp = w_conv * jnp.exp(logs)[None, :]                  # fold ActNorm scale into conv
    bp = (wp @ bias).reshape(c_x, 1)                      # folded bias
    _, logabsdet = jnp.linalg.slogdet(w_conv)
    ldj_const = jnp.float32(hw) * (jnp.sum(logs) + logabsdet)

    # Fused block-diagonal first-layer weight (bf16), 8-aligned row groups.
    inj_w1 = params["inj_w1"].astype(jnp.float32)          # (hidden, c_u)
    cpl_w1u = params["cpl_w1u"].astype(jnp.float32)        # (hidden, c_u)
    w_cat = jnp.zeros((rg + hg + hidden, c_x + c_u), jnp.float32)
    w_cat = w_cat.at[:c_x, :c_x].set(wp)
    w_cat = w_cat.at[rg:rg + hidden, c_x:].set(inj_w1)
    w_cat = w_cat.at[rg + hg:rg + hg + hidden, c_x:].set(cpl_w1u)
    w_cat = w_cat.astype(jnp.bfloat16)

    inj_b1 = params["inj_b1"].reshape(hidden, 1).astype(jnp.float32)
    inj_w2 = params["inj_w2"].astype(jnp.float32)          # (2*c_x, hidden)
    inj_b2 = params["inj_b2"].astype(jnp.float32)          # (2*c_x,)
    inj_w2_pad = jnp.zeros((2 * rg, hidden), jnp.float32)
    inj_w2_pad = inj_w2_pad.at[:c_x].set(inj_w2[:c_x]).at[rg:rg + c_x].set(inj_w2[c_x:])
    inj_w2_pad = inj_w2_pad.astype(jnp.bfloat16)
    inj_b2_pad = jnp.zeros((2 * rg, 1), jnp.float32)
    inj_b2_pad = inj_b2_pad.at[:c_x, 0].set(inj_b2[:c_x]).at[rg:rg + c_x, 0].set(inj_b2[c_x:])

    cpl_w1x = params["cpl_w1x"].astype(jnp.float32)        # (hidden, c_half)
    cpl_w1x_pad = jnp.zeros((hidden, c_x), jnp.float32).at[:, :c_half].set(cpl_w1x)
    cpl_w1x_pad = cpl_w1x_pad.astype(jnp.bfloat16)
    cpl_b1 = params["cpl_b1"].reshape(hidden, 1).astype(jnp.float32)
    cpl_w2 = params["cpl_w2"].astype(jnp.float32)          # (2*c_rest, hidden)
    cpl_b2 = params["cpl_b2"].astype(jnp.float32)          # (2*c_rest,)
    # Spread coupling scale/shift rows onto full-channel, 8-aligned groups
    # (rows for the xa half stay zero and are masked out in the kernel).
    cpl_w2_full = jnp.zeros((2 * rg, hidden), jnp.float32)
    cpl_w2_full = cpl_w2_full.at[c_half:c_x].set(cpl_w2[:c_rest])
    cpl_w2_full = cpl_w2_full.at[rg + c_half:rg + c_x].set(cpl_w2[c_rest:])
    cpl_w2_full = cpl_w2_full.astype(jnp.bfloat16)
    cpl_b2_full = jnp.zeros((2 * rg, 1), jnp.float32)
    cpl_b2_full = cpl_b2_full.at[c_half:c_x, 0].set(cpl_b2[:c_rest])
    cpl_b2_full = cpl_b2_full.at[rg + c_half:rg + c_x, 0].set(cpl_b2[c_rest:])

    weights = (w_cat, bp, inj_b1, inj_w2_pad, inj_b2_pad,
               cpl_w1x_pad, cpl_b1, cpl_w2_full, cpl_b2_full)

    # Explicit VMEM budget: double-buffered x/u/x_out blocks + resident weights + scratch.
    block_bytes = 2 * bytes_per_col * t_hw
    weight_bytes = sum(int(a.size) * a.dtype.itemsize for a in weights)
    scratch_bytes = rg * t_hw * 4
    vmem_limit = int(min(
        100 << 20,
        max(32 << 20, block_bytes + 2 * weight_bytes + scratch_bytes + (4 << 20))))

    def data_spec(c):
        return pl.BlockSpec((1, c, t_hw),
                            lambda b, s, t: (b, 0, s * tiles_per_split + t))

    def const_spec(arr):
        zeros = (0,) * arr.ndim
        return pl.BlockSpec(arr.shape, lambda b, s, t: zeros)

    kernel = functools.partial(_flow_step_kernel, c_x=c_x, c_half=c_half,
                               hidden=hidden, rg=rg, hg=hg)

    x_out, ldj_parts = pl.pallas_call(
        kernel,
        out_shape=(
            jax.ShapeDtypeStruct((n, c_x, hw), x_nchw.dtype),
            jax.ShapeDtypeStruct((n * hw_splits, 1, 1), jnp.float32),
        ),
        grid_spec=pltpu.PrefetchScalarGridSpec(
            num_scalar_prefetch=0,
            grid=(n, hw_splits, tiles_per_split),
            in_specs=[data_spec(c_x), data_spec(c_u)] + [const_spec(a) for a in weights],
            out_specs=[
                data_spec(c_x),
                pl.BlockSpec((1, 1, 1), lambda b, s, t: (b * hw_splits + s, 0, 0)),
            ],
            scratch_shapes=[pltpu.VMEM((c_x, t_hw), jnp.float32)],
        ),
        compiler_params=pltpu.CompilerParams(
            dimension_semantics=("parallel", "parallel", "arbitrary"),
            vmem_limit_bytes=vmem_limit),
    )(x, u, *weights)

    x_out_nchw = x_out.reshape(n, c_x, h, w)                        # free reshape
    ldj_total = ldj_parts.reshape(n, hw_splits).sum(axis=1) + ldj_const
    return x_out_nchw, ldj_total


def _reference_forward(x_nchw, u_nchw, params):
    """Pure-JAX f32 reference mirroring the PyTorch module math (unfolded)."""
    n, c_x, h, w = x_nchw.shape
    hw = h * w
    c_half = c_x // 2
    c_rest = c_x - c_half
    x = x_nchw.reshape(n, c_x, hw).astype(jnp.float32)
    u = u_nchw.reshape(n, u_nchw.shape[1], hw).astype(jnp.float32)

    logs, bias = params["an_logs"], params["an_bias"]
    x = (x + bias[None, :, None]) * jnp.exp(logs)[None, :, None]
    ldj = jnp.full((n,), hw * jnp.sum(logs), jnp.float32)

    W = params["w_conv"]
    x = jnp.einsum("oi,nip->nop", W, x)
    _, lad = jnp.linalg.slogdet(W)
    ldj = ldj + hw * lad

    h1 = jax.nn.relu(jnp.einsum("hc,ncp->nhp", params["inj_w1"], u)
                     + params["inj_b1"][None, :, None])
    est = jnp.einsum("oh,nhp->nop", params["inj_w2"], h1) + params["inj_b2"][None, :, None]
    s = jax.nn.sigmoid(est[:, :c_x] + 2.0)
    t = est[:, c_x:]
    x = x * s + t
    ldj = ldj + jnp.sum(jnp.log(s), axis=(1, 2))

    xa, xb = x[:, :c_half], x[:, c_half:]
    h2 = jax.nn.relu(jnp.einsum("hc,ncp->nhp", params["cpl_w1x"], xa)
                     + jnp.einsum("hc,ncp->nhp", params["cpl_w1u"], u)
                     + params["cpl_b1"][None, :, None])
    est2 = jnp.einsum("oh,nhp->nop", params["cpl_w2"], h2) + params["cpl_b2"][None, :, None]
    s2 = jax.nn.sigmoid(est2[:, :c_rest] + 2.0)
    t2 = est2[:, c_rest:]
    xb = xb * s2 + t2
    ldj = ldj + jnp.sum(jnp.log(s2), axis=(1, 2))
    x = jnp.concatenate([xa, xb], axis=1)
    return x.reshape(n, c_x, h, w), ldj


def make_params(key, c_x, c_u, hidden):
    c_half = c_x // 2
    c_rest = c_x - c_half
    ks = jax.random.split(key, 8)
    w_conv = jax.random.normal(ks[0], (c_x, c_x), jnp.float32)
    w_conv = w_conv + 0.5 * jnp.eye(c_x, dtype=jnp.float32)   # avoid near-singular
    return {
        "an_logs": 0.1 * jax.random.normal(ks[1], (c_x,), jnp.float32),
        "an_bias": 0.1 * jax.random.normal(ks[2], (c_x,), jnp.float32),
        "w_conv": w_conv,
        "inj_w1": 0.1 * jax.random.normal(ks[3], (hidden, c_u), jnp.float32),
        "inj_b1": jnp.zeros((hidden,), jnp.float32),
        "inj_w2": 0.1 * jax.random.normal(ks[4], (2 * c_x, hidden), jnp.float32),
        "inj_b2": jnp.zeros((2 * c_x,), jnp.float32),
        "cpl_w1x": 0.1 * jax.random.normal(ks[5], (hidden, c_half), jnp.float32),
        "cpl_w1u": 0.1 * jax.random.normal(ks[6], (hidden, c_u), jnp.float32),
        "cpl_b1": jnp.zeros((hidden,), jnp.float32),
        "cpl_w2": 0.1 * jax.random.normal(ks[7], (2 * c_rest, hidden), jnp.float32),
        "cpl_b2": jnp.zeros((2 * c_rest,), jnp.float32),
    }


if __name__ == "__main__":
    N, C_X, C_U, H, W, HIDDEN = 2, 4, 4, 16, 16, 32

    key = jax.random.PRNGKey(0)
    kx, ku, kp = jax.random.split(key, 3)
    x_nchw = jax.random.normal(kx, (N, C_X, H, W), jnp.float32)
    u_nchw = jax.random.normal(ku, (N, C_U, H, W), jnp.float32)
    params = make_params(kp, C_X, C_U, HIDDEN)

    x_ref_out, ldj_ref_out = _reference_forward(x_nchw, u_nchw, params)

    # bf16 MXU operands -> bf16-appropriate tolerances vs the f32 reference.
    configs = [
        dict(),                          # auto tile (largest dividing HW), auto splits
        dict(tile_hw=128, hw_splits=1),  # 2 HW tiles/batch: exercises the ldj scratch accumulation
        dict(tile_hw=128, hw_splits=2),  # HW split across "parallel" programs (v7x dual-TC path)
    ]
    for cfg in configs:
        x_out, ldj = flow_step_forward(x_nchw, u_nchw, params, **cfg)
        jax.block_until_ready((x_out, ldj))
        np.testing.assert_allclose(np.asarray(x_out), np.asarray(x_ref_out),
                                   rtol=2e-2, atol=1e-1)
        np.testing.assert_allclose(np.asarray(ldj), np.asarray(ldj_ref_out),
                                   rtol=1e-2, atol=1.0)

    print("KERNEL_OK")
</pallas_src>

<mosaic_0001>
module attributes {stable_mosaic.version = 11 : i64} {
  func.func @_flow_step_kernel(%arg0: i32, %arg1: i32, %arg2: i32, %arg3: memref<1x4x256xf32, #tpu.memory_space<vmem>>, %arg4: memref<1x4x256xf32, #tpu.memory_space<vmem>>, %arg5: memref<72x8xbf16, #tpu.memory_space<vmem>>, %arg6: memref<4x1xf32, #tpu.memory_space<vmem>>, %arg7: memref<32x1xf32, #tpu.memory_space<vmem>>, %arg8: memref<16x32xbf16, #tpu.memory_space<vmem>>, %arg9: memref<16x1xf32, #tpu.memory_space<vmem>>, %arg10: memref<32x4xbf16, #tpu.memory_space<vmem>>, %arg11: memref<32x1xf32, #tpu.memory_space<vmem>>, %arg12: memref<16x32xbf16, #tpu.memory_space<vmem>>, %arg13: memref<16x1xf32, #tpu.memory_space<vmem>>, %arg14: memref<1x4x256xf32, #tpu.memory_space<vmem>>, %arg15: memref<1x1x1xf32, #tpu.memory_space<vmem>>, %arg16: memref<4x256xf32, #tpu.memory_space<vmem>>) attributes {dimension_semantics = [#tpu.dimension_semantics<parallel>, #tpu.dimension_semantics<parallel>, #tpu.dimension_semantics<arbitrary>], iteration_bounds = array<i64: 2, 1, 1>, scalar_prefetch = 0 : i64, scratch_operands = 1 : i64, tpu.core_type = #tpu.core_type<tc>, window_params = [{transform_indices = @transform_0, window_bounds = array<i64: 1, 4, 256>}, {transform_indices = @transform_1, window_bounds = array<i64: 1, 4, 256>}, {pipeline_mode = #tpu.pipeline_mode<synchronous>, transform_indices = @transform_2, window_bounds = array<i64: 72, 8>}, {pipeline_mode = #tpu.pipeline_mode<synchronous>, transform_indices = @transform_3, window_bounds = array<i64: 4, 1>}, {pipeline_mode = #tpu.pipeline_mode<synchronous>, transform_indices = @transform_4, window_bounds = array<i64: 32, 1>}, {pipeline_mode = #tpu.pipeline_mode<synchronous>, transform_indices = @transform_5, window_bounds = array<i64: 16, 32>}, {pipeline_mode = #tpu.pipeline_mode<synchronous>, transform_indices = @transform_6, window_bounds = array<i64: 16, 1>}, {pipeline_mode = #tpu.pipeline_mode<synchronous>, transform_indices = @transform_7, window_bounds = array<i64: 32, 4>}, {pipeline_mode = #tpu.pipeline_mode<synchronous>, transform_indices = @transform_8, window_bounds = array<i64: 32, 1>}, {pipeline_mode = #tpu.pipeline_mode<synchronous>, transform_indices = @transform_9, window_bounds = array<i64: 16, 32>}, {pipeline_mode = #tpu.pipeline_mode<synchronous>, transform_indices = @transform_10, window_bounds = array<i64: 16, 1>}, {transform_indices = @transform_11, window_bounds = array<i64: 1, 4, 256>}, {transform_indices = @transform_12, window_bounds = array<i64: 1, 1, 1>}]} {
    %c0_i32 = arith.constant 0 : i32
    %0 = arith.cmpi eq, %arg2, %c0_i32 : i32
    %1 = arith.extui %0 : i1 to i32
    %c0_i32_0 = arith.constant 0 : i32
    %2 = arith.cmpi ne, %1, %c0_i32_0 : i32
    scf.if %2 {
      %cst_51 = arith.constant 0.000000e+00 : f32
      %105 = vector.broadcast %cst_51 : f32 to vector<4x256xf32>
      %c0_52 = arith.constant 0 : index
      %c0_53 = arith.constant 0 : index
      %106 = vector.load %arg16[%c0_52, %c0_53] : memref<4x256xf32, #tpu.memory_space<vmem>>, vector<4x256xf32>
      tpu.vector_store %arg16[%c0_52, %c0_53], %105 {strides = array<i32>} : memref<4x256xf32, #tpu.memory_space<vmem>>, vector<4x256xf32>,
    } else {
    }
    %c0 = arith.constant 0 : index
    %c0_1 = arith.constant 0 : index
    %c0_2 = arith.constant 0 : index
    %3 = vector.load %arg3[%c0, %c0_1, %c0_2] : memref<1x4x256xf32, #tpu.memory_space<vmem>>, vector<1x4x256xf32>
    %4 = vector.shape_cast %3 : vector<1x4x256xf32> to vector<4x256xf32>
    %c0_3 = arith.constant 0 : index
    %c0_4 = arith.constant 0 : index
    %c0_5 = arith.constant 0 : index
    %5 = vector.load %arg4[%c0_3, %c0_4, %c0_5] : memref<1x4x256xf32, #tpu.memory_space<vmem>>, vector<1x4x256xf32>
    %6 = vector.shape_cast %5 : vector<1x4x256xf32> to vector<4x256xf32>
    %7 = tpu.concatenate %4, %6 in 0 : vector<4x256xf32>, vector<4x256xf32> -> vector<8x256xf32>
    %8 = arith.truncf %7 : vector<8x256xf32> to vector<8x256xbf16>
    %c0_6 = arith.constant 0 : index
    %c0_7 = arith.constant 0 : index
    %9 = vector.load %arg5[%c0_6, %c0_7] : memref<72x8xbf16, #tpu.memory_space<vmem>>, vector<72x8xbf16>
    %cst = arith.constant dense<0.000000e+00> : vector<72x256xf32>
    %10 = tpu.matmul %9, %8, %cst {dimension_numbers = #tpu.dot_dimension_numbers<[1], [0], [0], [1], [0, 0, 1, 1], [], []>} : vector<72x8xbf16>, vector<8x256xbf16>, vector<72x256xf32> -> vector<72x256xf32>
    %11 = vector.extract_strided_slice %10 {offsets = [0, 0], sizes = [4, 256], strides = [1, 1]} : vector<72x256xf32> to vector<4x256xf32>
    %c0_8 = arith.constant 0 : index
    %c0_9 = arith.constant 0 : index
    %12 = vector.load %arg6[%c0_8, %c0_9] : memref<4x1xf32, #tpu.memory_space<vmem>>, vector<4x1xf32>
    %13 = vector.broadcast %12 : vector<4x1xf32> to vector<4x256xf32>
    %14 = arith.addf %11, %13 : vector<4x256xf32>
    %15 = vector.extract_strided_slice %10 {offsets = [8, 0], sizes = [32, 256], strides = [1, 1]} : vector<72x256xf32> to vector<32x256xf32>
    %16 = vector.extract_strided_slice %10 {offsets = [40, 0], sizes = [32, 256], strides = [1, 1]} : vector<72x256xf32> to vector<32x256xf32>
    %c0_10 = arith.constant 0 : index
    %c0_11 = arith.constant 0 : index
    %17 = vector.load %arg7[%c0_10, %c0_11] : memref<32x1xf32, #tpu.memory_space<vmem>>, vector<32x1xf32>
    %18 = vector.broadcast %17 : vector<32x1xf32> to vector<32x256xf32>
    %19 = arith.addf %15, %18 : vector<32x256xf32>
    %cst_12 = arith.constant 0.000000e+00 : f32
    %20 = vector.broadcast %cst_12 : f32 to vector<32x256xf32>
    %21 = arith.maximumf %19, %20 : vector<32x256xf32>
    %c0_13 = arith.constant 0 : index
    %c0_14 = arith.constant 0 : index
    %22 = vector.load %arg8[%c0_13, %c0_14] : memref<16x32xbf16, #tpu.memory_space<vmem>>, vector<16x32xbf16>
    %23 = arith.truncf %21 : vector<32x256xf32> to vector<32x256xbf16>
    %cst_15 = arith.constant dense<0.000000e+00> : vector<16x256xf32>
    %24 = tpu.matmul %22, %23, %cst_15 {dimension_numbers = #tpu.dot_dimension_numbers<[1], [0], [0], [1], [0, 0, 1, 1], [], []>} : vector<16x32xbf16>, vector<32x256xbf16>, vector<16x256xf32> -> vector<16x256xf32>
    %c0_16 = arith.constant 0 : index
    %c0_17 = arith.constant 0 : index
    %25 = vector.load %arg9[%c0_16, %c0_17] : memref<16x1xf32, #tpu.memory_space<vmem>>, vector<16x1xf32>
    %26 = vector.broadcast %25 : vector<16x1xf32> to vector<16x256xf32>
    %27 = arith.addf %24, %26 : vector<16x256xf32>
    %28 = vector.extract_strided_slice %27 {offsets = [0, 0], sizes = [4, 256], strides = [1, 1]} : vector<16x256xf32> to vector<4x256xf32>
    %cst_18 = arith.constant 2.000000e+00 : f32
    %29 = vector.broadcast %cst_18 : f32 to vector<4x256xf32>
    %30 = arith.addf %28, %29 : vector<4x256xf32>
    %31 = math.absf %30 : vector<4x256xf32>
    %cst_19 = arith.constant 0.000000e+00 : f32
    %32 = vector.broadcast %cst_19 : f32 to vector<4x256xf32>
    %33 = arith.subf %32, %31 : vector<4x256xf32>
    %34 = math.exp %33 : vector<4x256xf32>
    %cst_20 = arith.constant 1.000000e+00 : f32
    %35 = vector.broadcast %cst_20 : f32 to vector<4x256xf32>
    %36 = arith.addf %35, %34 : vector<4x256xf32>
    %37 = tpu.reciprocal %36 {approx = true} : vector<4x256xf32> -> vector<4x256xf32>
    %cst_21 = arith.constant 0.000000e+00 : f32
    %38 = vector.broadcast %cst_21 : f32 to vector<4x256xf32>
    %39 = arith.cmpf oge, %30, %38 : vector<4x256xf32>
    %40 = arith.mulf %34, %37 : vector<4x256xf32>
    %41 = arith.select %39, %37, %40 : vector<4x256xi1>, vector<4x256xf32>
    %cst_22 = arith.constant 0.000000e+00 : f32
    %42 = vector.broadcast %cst_22 : f32 to vector<4x256xf32>
    %43 = arith.minimumf %30, %42 : vector<4x256xf32>
    %cst_23 = arith.constant 1.000000e+00 : f32
    %44 = vector.broadcast %cst_23 : f32 to vector<4x256xf32>
    %45 = arith.addf %44, %34 : vector<4x256xf32>
    %46 = math.log %45 : vector<4x256xf32>
    %47 = arith.subf %43, %46 : vector<4x256xf32>
    %48 = arith.mulf %14, %41 : vector<4x256xf32>
    %49 = vector.extract_strided_slice %27 {offsets = [8, 0], sizes = [4, 256], strides = [1, 1]} : vector<16x256xf32> to vector<4x256xf32>
    %50 = arith.addf %48, %49 : vector<4x256xf32>
    %c0_24 = arith.constant 0 : index
    %c0_25 = arith.constant 0 : index
    %51 = vector.load %arg10[%c0_24, %c0_25] : memref<32x4xbf16, #tpu.memory_space<vmem>>, vector<32x4xbf16>
    %52 = arith.truncf %50 : vector<4x256xf32> to vector<4x256xbf16>
    %cst_26 = arith.constant dense<0.000000e+00> : vector<32x256xf32>
    %53 = tpu.matmul %51, %52, %cst_26 {dimension_numbers = #tpu.dot_dimension_numbers<[1], [0], [0], [1], [0, 0, 1, 1], [], []>} : vector<32x4xbf16>, vector<4x256xbf16>, vector<32x256xf32> -> vector<32x256xf32>
    %54 = arith.addf %53, %16 : vector<32x256xf32>
    %c0_27 = arith.constant 0 : index
    %c0_28 = arith.constant 0 : index
    %55 = vector.load %arg11[%c0_27, %c0_28] : memref<32x1xf32, #tpu.memory_space<vmem>>, vector<32x1xf32>
    %56 = vector.broadcast %55 : vector<32x1xf32> to vector<32x256xf32>
    %57 = arith.addf %54, %56 : vector<32x256xf32>
    %cst_29 = arith.constant 0.000000e+00 : f32
    %58 = vector.broadcast %cst_29 : f32 to vector<32x256xf32>
    %59 = arith.maximumf %57, %58 : vector<32x256xf32>
    %c0_30 = arith.constant 0 : index
    %c0_31 = arith.constant 0 : index
    %60 = vector.load %arg12[%c0_30, %c0_31] : memref<16x32xbf16, #tpu.memory_space<vmem>>, vector<16x32xbf16>
    %61 = arith.truncf %59 : vector<32x256xf32> to vector<32x256xbf16>
    %cst_32 = arith.constant dense<0.000000e+00> : vector<16x256xf32>
    %62 = tpu.matmul %60, %61, %cst_32 {dimension_numbers = #tpu.dot_dimension_numbers<[1], [0], [0], [1], [0, 0, 1, 1], [], []>} : vector<16x32xbf16>, vector<32x256xbf16>, vector<16x256xf32> -> vector<16x256xf32>
    %c0_33 = arith.constant 0 : index
    %c0_34 = arith.constant 0 : index
    %63 = vector.load %arg13[%c0_33, %c0_34] : memref<16x1xf32, #tpu.memory_space<vmem>>, vector<16x1xf32>
    %64 = vector.broadcast %63 : vector<16x1xf32> to vector<16x256xf32>
    %65 = arith.addf %62, %64 : vector<16x256xf32>
    %66 = vector.extract_strided_slice %65 {offsets = [0, 0], sizes = [4, 256], strides = [1, 1]} : vector<16x256xf32> to vector<4x256xf32>
    %cst_35 = arith.constant 2.000000e+00 : f32
    %67 = vector.broadcast %cst_35 : f32 to vector<4x256xf32>
    %68 = arith.addf %66, %67 : vector<4x256xf32>
    %69 = math.absf %68 : vector<4x256xf32>
    %cst_36 = arith.constant 0.000000e+00 : f32
    %70 = vector.broadcast %cst_36 : f32 to vector<4x256xf32>
    %71 = arith.subf %70, %69 : vector<4x256xf32>
    %72 = math.exp %71 : vector<4x256xf32>
    %cst_37 = arith.constant 1.000000e+00 : f32
    %73 = vector.broadcast %cst_37 : f32 to vector<4x256xf32>
    %74 = arith.addf %73, %72 : vector<4x256xf32>
    %75 = tpu.reciprocal %74 {approx = true} : vector<4x256xf32> -> vector<4x256xf32>
    %cst_38 = arith.constant 0.000000e+00 : f32
    %76 = vector.broadcast %cst_38 : f32 to vector<4x256xf32>
    %77 = arith.cmpf oge, %68, %76 : vector<4x256xf32>
    %78 = arith.mulf %72, %75 : vector<4x256xf32>
    %79 = arith.select %77, %75, %78 : vector<4x256xi1>, vector<4x256xf32>
    %cst_39 = arith.constant 0.000000e+00 : f32
    %80 = vector.broadcast %cst_39 : f32 to vector<4x256xf32>
    %81 = arith.minimumf %68, %80 : vector<4x256xf32>
    %cst_40 = arith.constant 1.000000e+00 : f32
    %82 = vector.broadcast %cst_40 : f32 to vector<4x256xf32>
    %83 = arith.addf %82, %72 : vector<4x256xf32>
    %84 = math.log %83 : vector<4x256xf32>
    %85 = arith.subf %81, %84 : vector<4x256xf32>
    %86 = tpu.iota {dimensions = array<i32: 0>} : vector<4x256xi32>
    %c2_i32 = arith.constant 2 : i32
    %87 = vector.broadcast %c2_i32 : i32 to vector<4x256xi32>
    %88 = arith.cmpi sge, %86, %87 : vector<4x256xi32>
    %89 = arith.mulf %50, %79 : vector<4x256xf32>
    %90 = vector.extract_strided_slice %65 {offsets = [8, 0], sizes = [4, 256], strides = [1, 1]} : vector<16x256xf32> to vector<4x256xf32>
    %91 = arith.addf %89, %90 : vector<4x256xf32>
    %92 = arith.select %88, %91, %50 : vector<4x256xi1>, vector<4x256xf32>
    %c0_41 = arith.constant 0 : index
    %c0_42 = arith.constant 0 : index
    %c0_43 = arith.constant 0 : index
    %93 = vector.load %arg14[%c0_41, %c0_42, %c0_43] : memref<1x4x256xf32, #tpu.memory_space<vmem>>, vector<1x4x256xf32>
    %94 = vector.shape_cast %93 : vector<1x4x256xf32> to vector<4x256xf32>
    %95 = vector.shape_cast %92 : vector<4x256xf32> to vector<1x4x256xf32>
    tpu.vector_store %arg14[%c0_41, %c0_42, %c0_43], %95 {strides = array<i32>} : memref<1x4x256xf32, #tpu.memory_space<vmem>>, vector<1x4x256xf32>,
    %c0_44 = arith.constant 0 : index
    %c0_45 = arith.constant 0 : index
    %96 = vector.load %arg16[%c0_44, %c0_45] : memref<4x256xf32, #tpu.memory_space<vmem>>, vector<4x256xf32>
    %97 = arith.addf %96, %47 : vector<4x256xf32>
    %cst_46 = arith.constant 0.000000e+00 : f32
    %98 = vector.broadcast %cst_46 : f32 to vector<4x256xf32>
    %99 = arith.select %88, %85, %98 : vector<4x256xi1>, vector<4x256xf32>
    %100 = arith.addf %97, %99 : vector<4x256xf32>
    %c0_47 = arith.constant 0 : index
    %c0_48 = arith.constant 0 : index
    %101 = vector.load %arg16[%c0_47, %c0_48] : memref<4x256xf32, #tpu.memory_space<vmem>>, vector<4x256xf32>
    tpu.vector_store %arg16[%c0_47, %c0_48], %100 {strides = array<i32>} : memref<4x256xf32, #tpu.memory_space<vmem>>, vector<4x256xf32>,
    %c0_i32_49 = arith.constant 0 : i32
    %102 = arith.cmpi eq, %arg2, %c0_i32_49 : i32
    %103 = arith.extui %102 : i1 to i32
    %c0_i32_50 = arith.constant 0 : i32
    %104 = arith.cmpi ne, %103, %c0_i32_50 : i32
    scf.if %104 {
      %cst_51 = arith.constant 0.000000e+00 : f32
      %105 = vector.broadcast %cst_51 : f32 to vector<1x1x1xf32>
      %c0_52 = arith.constant 0 : index
      %c0_53 = arith.constant 0 : index
      %106 = vector.load %arg16[%c0_52, %c0_53] : memref<4x256xf32, #tpu.memory_space<vmem>>, vector<4x256xf32>
      %107 = vector.shape_cast %106 : vector<4x256xf32> to vector<1x4x256xf32>
      %cst_54 = arith.constant dense<0.000000e+00> : vector<1xf32>
      %108 = vector.multi_reduction <add>, %107, %cst_54 [1, 2] : vector<1x4x256xf32> to vector<1xf32>
      %109 = vector.shape_cast %108 : vector<1xf32> to vector<1x1x1xf32>
      %110 = vector.extract %109[0, 0, 0] : f32 from vector<1x1x1xf32>
      %111 = vector.broadcast %110 : f32 to vector<1x1x1xf32>
      %112 = arith.addf %105, %111 : vector<1x1x1xf32>
      %c0_55 = arith.constant 0 : index
      %c0_56 = arith.constant 0 : index
      %c0_57 = arith.constant 0 : index
      %113 = vector.load %arg15[%c0_55, %c0_56, %c0_57] : memref<1x1x1xf32, #tpu.memory_space<vmem>>, vector<1x1x1xf32>
      tpu.vector_store %arg15[%c0_55, %c0_56, %c0_57], %112 {strides = array<i32>} : memref<1x1x1xf32, #tpu.memory_space<vmem>>, vector<1x1x1xf32>,
    } else {
    }
    return
  }
  func.func @transform_0(%arg0: i32, %arg1: i32, %arg2: i32) -> (i32, i32, i32) {
    %c1_i32 = arith.constant 1 : i32
    %0 = arith.muli %arg1, %c1_i32 : i32
    %1 = arith.addi %0, %arg2 : i32
    %c0_i32 = arith.constant 0 : i32
    %c0_i32_0 = arith.constant 0 : i32
    return %arg0, %c0_i32, %1 : i32, i32, i32
  }
  func.func @transform_1(%arg0: i32, %arg1: i32, %arg2: i32) -> (i32, i32, i32) {
    %c1_i32 = arith.constant 1 : i32
    %0 = arith.muli %arg1, %c1_i32 : i32
    %1 = arith.addi %0, %arg2 : i32
    %c0_i32 = arith.constant 0 : i32
    %c0_i32_0 = arith.constant 0 : i32
    return %arg0, %c0_i32, %1 : i32, i32, i32
  }
  func.func @transform_2(%arg0: i32, %arg1: i32, %arg2: i32) -> (i32, i32) {
    %c0_i32 = arith.constant 0 : i32
    %c0_i32_0 = arith.constant 0 : i32
    %c0_i32_1 = arith.constant 0 : i32
    return %c0_i32, %c0_i32_0 : i32, i32
  }
  func.func @transform_3(%arg0: i32, %arg1: i32, %arg2: i32) -> (i32, i32) {
    %c0_i32 = arith.constant 0 : i32
    %c0_i32_0 = arith.constant 0 : i32
    %c0_i32_1 = arith.constant 0 : i32
    return %c0_i32, %c0_i32_0 : i32, i32
  }
  func.func @transform_4(%arg0: i32, %arg1: i32, %arg2: i32) -> (i32, i32) {
    %c0_i32 = arith.constant 0 : i32
    %c0_i32_0 = arith.constant 0 : i32
    %c0_i32_1 = arith.constant 0 : i32
    return %c0_i32, %c0_i32_0 : i32, i32
  }
  func.func @transform_5(%arg0: i32, %arg1: i32, %arg2: i32) -> (i32, i32) {
    %c0_i32 = arith.constant 0 : i32
    %c0_i32_0 = arith.constant 0 : i32
    %c0_i32_1 = arith.constant 0 : i32
    return %c0_i32, %c0_i32_0 : i32, i32
  }
  func.func @transform_6(%arg0: i32, %arg1: i32, %arg2: i32) -> (i32, i32) {
    %c0_i32 = arith.constant 0 : i32
    %c0_i32_0 = arith.constant 0 : i32
    %c0_i32_1 = arith.constant 0 : i32
    return %c0_i32, %c0_i32_0 : i32, i32
  }
  func.func @transform_7(%arg0: i32, %arg1: i32, %arg2: i32) -> (i32, i32) {
    %c0_i32 = arith.constant 0 : i32
    %c0_i32_0 = arith.constant 0 : i32
    %c0_i32_1 = arith.constant 0 : i32
    return %c0_i32, %c0_i32_0 : i32, i32
  }
  func.func @transform_8(%arg0: i32, %arg1: i32, %arg2: i32) -> (i32, i32) {
    %c0_i32 = arith.constant 0 : i32
    %c0_i32_0 = arith.constant 0 : i32
    %c0_i32_1 = arith.constant 0 : i32
    return %c0_i32, %c0_i32_0 : i32, i32
  }
  func.func @transform_9(%arg0: i32, %arg1: i32, %arg2: i32) -> (i32, i32) {
    %c0_i32 = arith.constant 0 : i32
    %c0_i32_0 = arith.constant 0 : i32
    %c0_i32_1 = arith.constant 0 : i32
    return %c0_i32, %c0_i32_0 : i32, i32
  }
  func.func @transform_10(%arg0: i32, %arg1: i32, %arg2: i32) -> (i32, i32) {
    %c0_i32 = arith.constant 0 : i32
    %c0_i32_0 = arith.constant 0 : i32
    %c0_i32_1 = arith.constant 0 : i32
    return %c0_i32, %c0_i32_0 : i32, i32
  }
  func.func @transform_11(%arg0: i32, %arg1: i32, %arg2: i32) -> (i32, i32, i32) {
    %c1_i32 = arith.constant 1 : i32
    %0 = arith.muli %arg1, %c1_i32 : i32
    %1 = arith.addi %0, %arg2 : i32
    %c0_i32 = arith.constant 0 : i32
    %c0_i32_0 = arith.constant 0 : i32
    return %arg0, %c0_i32, %1 : i32, i32, i32
  }
  func.func @transform_12(%arg0: i32, %arg1: i32, %arg2: i32) -> (i32, i32, i32) {
    %c1_i32 = arith.constant 1 : i32
    %0 = arith.muli %arg0, %c1_i32 : i32
    %1 = arith.addi %0, %arg1 : i32
    %c0_i32 = arith.constant 0 : i32
    %c0_i32_0 = arith.constant 0 : i32
    %c0_i32_1 = arith.constant 0 : i32
    return %1, %c0_i32, %c0_i32_0 : i32, i32, i32
  }
}

</mosaic_0001>

<bundles_post_ra>
// kernel: tpu_custom_call.1
= control target key start
LH: loop header
LB: loop body
LE: loop exit
PB: predicated region body
PF: predicated region fallthrough
CT: control target
= control target key end

     0   :  { %s1719_s0 = inlined_call_operand.vmem [shape: f32[2,4,256], index: 0, kind: input, shape index: {}]   ;;  %s1720_s1 = inlined_call_operand.vmem [shape: f32[2,4,256], index: 1, kind: input, shape index: {}]   ;;  %s1721_s2 = inlined_call_operand.vmem [shape: bf16[72,8], index: 2, kind: input, shape index: {}]   ;;  %s1722_s3 = inlined_call_operand.vmem [shape: f32[4,1], index: 3, kind: input, shape index: {}]   ;;  %s1723_s4 = inlined_call_operand.vmem [shape: f32[32,1], index: 4, kind: input, shape index: {}]   ;;  %s1724_s5 = inlined_call_operand.vmem [shape: bf16[16,32], index: 5, kind: input, shape index: {}]   ;;  %s1725_s6 = inlined_call_operand.vmem [shape: f32[16,1], index: 6, kind: input, shape index: {}]   ;;  %s1726_s7 = inlined_call_operand.vmem [shape: bf16[32,4], index: 7, kind: input, shape index: {}]   ;;  %s1727_s8 = inlined_call_operand.vmem [shape: f32[32,1], index: 8, kind: input, shape index: {}]   ;;  %s1728_s9 = inlined_call_operand.vmem [shape: bf16[16,32], index: 9, kind: input, shape index: {}]   ;;  %s1729_s10 = inlined_call_operand.vmem [shape: f32[16,1], index: 10, kind: input, shape index: {}]   ;;  %s1730_s11 = inlined_call_operand.hbm [shape: f32[2,4,256], index: 11, kind: output, shape index: {0}]   ;;  %s1731_s12 = inlined_call_operand.vmem [shape: f32[2,1,1], index: 12, kind: output, shape index: {1}]  }
   0x1   :  { %1735 = sst [smem:[#allocation10_spill]] %s1719_s0 }
   0x2   :  { %1736 = sst [smem:[#allocation11_spill]] %s1720_s1 }
   0x3   :  { %1737 = sst [smem:[#allocation12_spill]] %s1721_s2 }
   0x4   :  { %1738 = sst [smem:[#allocation13_spill]] %s1722_s3 }
   0x5   :  { %18 = vsyncpa [#allocation4], 0 }
   0x6   :  { %20 = vsyncpa [#allocation4 + $0x1], 0  ;;  %s1498_s21 = smov 0   ;;  %s1500_s22 = smov 0  }
   0x7   :  { %s1502_s23 = smov 0   ;;  %s1504_s24 = smov 0  }
   0x8   :  { %s1506_s25 = smov 0   ;;  %s1508_s26 = smov 0  }
   0x9 LB: > { %1739 = sst [smem:[#allocation6_spill]] %s1418_s23  ;;  %s1191_s27 = sadd.s32 4294967295, %s1430_s26   ;;  %s1430_s26 = sphi %s1508_s26, %s26_s26   ;;  %s1426_s25 = sphi %s1506_s25, %s1752_s25   ;;  %s1422_s24 = sphi %s1504_s24, %s1751_s24   ;;  %s1418_s23 = sphi %s1502_s23, %s1750_s23   ;;  %s1414_s22 = sphi %s1500_s22, %s1754_s22   ;;  %s1410_s21 = sphi %s1498_s21, %s1753_s21  }
   0xa   : > { %1740 = sst [smem:[#allocation7_spill]] %s1426_s25  ;;  %s1192_s28 = sadd.s32 4294967294, %s1430_s26  }
   0xb   : > { %s45_s29 = sadd.s32 1, %s1426_s25  ;;  %s305_s30 = sadd.s32 1, %s1418_s23 }
   0xc   : > { %p47_p0 = scmp.ge.s32.totalorder %s45_s29, 2  ;;  %p315_p1 = scmp.ne.s32.totalorder %s1418_s23, %s1414_s22 }
   0xd   : > { %p316_p2 = scmp.eq.s32.totalorder %s1191_s27, 1  ;;  %p321_p3 = scmp.ne.s32.totalorder %s1414_s22, %s1410_s21 }
   0xe   : > { %s1756_s29 = smov (%p47_p0, %s45_s29), 0  ;;  %p322_p5 = scmp.eq.s32.totalorder %s1192_s28, 1 }
   0xf   : > { %1741 = sst [smem:[#allocation8_spill]] %s1756_s29  ;;  %p1538_p4 = por %p316_p2, %p315_p1 }
  0x10   : > { %s300_s14 = ssub.s32 %s1426_s25, %s1756_s29  ;;  %p1195_p6 = scmp.ge.s32.totalorder %s1430_s26, 1 }
  0x11   : > { %p303_p7 = scmp.eq.s32.totalorder %s300_s14, 0  ;;  %p1545_p8 = por %p322_p5, %p321_p3 }
  0x12   : > { %p425_p9 = scmp.lt.s32.totalorder %s1430_s26, 3 }
  0x13   : > { %s1551_s16 = scalar_select %p303_p7, %s1418_s23, %s305_s30  }
  0x14   : > { %p426_p10 = pnand %p1195_p6, %p425_p9 }
  0x15   : > { %1744 = sst [smem:[#allocation9_spill]] %s1551_s16  ;;  %p488_p11 = scmp.lt.s32.totalorder (!%p426_p10), %s1422_s24, 1 }
  0x16   : > { %429 = sbr.rel (%p426_p10) target bundleno = 930 (0x3a2), region = 64  ;;  %s1745_s0 = sld [smem:[#allocation10_spill]] (!%p426_p10) }
  0x17   : > { %s1746_s1 = sld [smem:[#allocation11_spill]] (!%p426_p10)  ;;  %s477_s17 = sand.u32 (!%p426_p10), 1, %s1414_s22  }
  0x18   : > { %s1747_s2 = sld [smem:[#allocation12_spill]] (!%p426_p10)  ;;  %s1196_s25 = sshll.u32 (!%p426_p10), %s477_s17, 3 }
  0x19   : > { %s1748_s3 = sld [smem:[#allocation13_spill]] (!%p426_p10)  ;;  %s1266_s23 = sshll.u32 (!%p426_p10), %s1422_s24, 3 }
  0x1a   : > { %s1064_s19 = scalar_lea.hbm (!%p426_p10), %s1730_s11, %s1266_s23 }
  0x1b   : > { %v671_v0 = vld [vmem:[%s1723_s4] sm:$0xff]  ;;  %v1432_v1 = vmov 0   ;;  %v673_v2 = vld [vmem:[%s1723_s4 + $0x10] sm:$0xff]  ;;  %s1561_s27 = scalar_select %p488_p11, %s1422_s24, 1  ;;  %v672_v4 = vld [vmem:[%s1723_s4 + $0x8] sm:$0xff]  ;;  %vm538_vm0 = vcmask 1043456  }
  0x1c   : > { %1326 = vset.pattern.permute.xlu1 %v1432_v1  ;;  %1325 = vset.pattern.permute.xlu0 %v1432_v1  ;;  %v674_v8 = vld [vmem:[%s1723_s4 + $0x18] sm:$0xff]  ;;  %v868_v9 = vld [vmem:[%s1727_s8 + $0x10] sm:$0xff]  ;;  %v717_v10 = vld [vmem:[%s1725_s6] sm:$0xff]  ;;  %vm575_vm1 = vcmask 64512   ;;  %vm734_vm2 = vcmask 261120   ;;  %vm821_vm5 = vcmask 1041408  }
  0x1d   : > { %677 = vperm.xlu1 %1326, %v671_v0   ;;  %687 = vperm.xlu0 %1325, %v673_v2   ;;  %s1256_s28 = sshll.u32 %s1561_s27, 3  ;;  %v718_v11 = vld [vmem:[%s1725_s6 + $0x8] sm:$0xff]  ;;  %v866_v22 = vld [vmem:[%s1727_s8] sm:$0xff]  ;;  %v869_v31 = vld [vmem:[%s1727_s8 + $0x18] sm:$0xff]  ;;  %vm814_vm6 = vcmask 31744   ;;  %s1068_s30 = sshll.u32 %s1064_s19, 4  ;;  %s1069_s30 = int_to_ptr.hbm [resolvable:$true] %s1068_s30 }
  0x1e   : > { %1327 = vset.pattern.permute.xlu2 %v1432_v1  ;;  %s495_s29 = scalar_lea.vmem %s1745_s0, %s1256_s28  ;;  %s507_s20 = scalar_lea.vmem %s1746_s1, %s1256_s28  ;;  %v867_v16 = vld [vmem:[%s1727_s8 + $0x8] sm:$0xff]  ;;  %v1258_v21 = vld [vmem:[%s1747_s2] sm:$0xff]  ;;  %v1260_v26 = vld [vmem:[%s1747_s2 + $0x10] sm:$0xff] }
  0x1f   : > { %v523_v3 = vld [vmem:[%s495_s29] sm:$0xff]  ;;  %721 = vperm.xlu2 %1327, %v717_v10   ;;  %v913_v24 = vld [vmem:[%s1729_s10 + $0x8] sm:$0xff]  ;;  %s479_s28 = scalar_lea.vmem [#allocation3], %s1196_s25  ;;  %s1046_s29 = scalar_lea.sflag [#allocation4], %s477_s17 }
  0x20   : > { %526 = vst [vmem:[#allocation1] ss:$2 sm:$0xff] %v523_v3  ;;  %v524_v5 = vld [vmem:[%s507_s20] sm:$0xff]  ;;  %v1259_v25 = vld [vmem:[%s1747_s2 + $0x8] sm:$0xff]  ;;  %s1066_s20 = sshll.u32 %s479_s28, 4  ;;  %s1366_s14 = sshra.s32 %s1069_s30, 4  ;;  %s1067_s20 = int_to_ptr.vmem [resolvable:$true] %s1066_s20  ;;  %s1367_s14 = int_to_ptr.hbm [resolvable:$true] %s1366_s14 }
  0x21   : > { %v663_v23 = vld [vmem:[%s1748_s3] sm:$0xf]  ;;  %s1368_s25 = scalar_lea.hbm %s1367_s14, 8  ;;  %s1372_s24 = scalar_lea.hbm %s1730_s11, 16 }
  0x22   : > { %v912_v34 = vld [vmem:[%s1729_s10] sm:$0xff]  ;;  %p1369_p12 = scmp.ne.s32.totalorder %s1367_s14, %s1368_s25  ;;  %p1373_p1 = scmp.lt.s32.totalorder %s1367_s14, %s1730_s11 }
  0x23   : > { %v1262_v63 = vld [vmem:[%s1724_s5] sm:$0xff]  ;;  %p1374_p2 = scmp.lt.s32.totalorder %s1372_s24, %s1368_s25 }
  0x24   : > { %p1370_p13 = pnand %p1369_p12, %p1538_p4 }
  0x25   : > { %682 = vperm.xlu1 %1326, %v672_v4   ;;  %692 = vperm.xlu0 %1325, %v674_v8   ;;  %p1375_p3 = por %p1374_p2, %p1373_p1 }
  0x26   : > { %p1371_p0 = pneg %p1370_p13 }
  0x27   : > { %v527_v6 = vld.sshfl [vmem:[#allocation1] sm:$0xff pattern:$0x75316420]  ;;  %v528_v7 = vld.sshfl [vmem:[#allocation1 + $0x8] sm:$0xff pattern:$0x75316420]  ;;  %666 = vperm.xlu2 %1327, %v663_v23  }
  0x28   : > { %533 = vst [vmem:[#allocation1 + $0x1] ss:$2 sm:$0xff] %v524_v5  ;;  %p1376_p5 = pnand %p1375_p3, %p1371_p0 }
  0x2d   : > { %882 = vperm.xlu1 %1326, %v868_v9   ;;  %726 = vperm.xlu0 %1325, %v718_v11  }
  0x2f   : > { %v534_v12 = vld.sshfl [vmem:[#allocation1] sm:$0xff pattern:$0x75316420]  ;;  %v535_v13 = vld.sshfl [vmem:[#allocation1 + $0x8] sm:$0xff pattern:$0x75316420]  ;;  %887 = vperm.xlu2 %1327, %v869_v31  }
  0x30   : > { %v539_v14 = vsel %vm538_vm0, %v527_v6, %v534_v12  ;;  %v540_v15 = vsel %vm538_vm0, %v528_v7, %v535_v13  ;;  %v1261_v13 = vld [vmem:[%s1747_s2 + $0x18] sm:$0xff] }
  0x31   : > { %v541_v17 = vpack.c.bf16 %v539_v14, %v539_v14  ;;  %v542_v18 = vpack.c.bf16 %v540_v15, %v540_v15 }
  0x33   : > { %v592_v19 = vsel %vm538_vm0, %v541_v17, 0  ;;  %v595_v20 = vsel %vm538_vm0, %v542_v18, 0 }
  0x34   : > { %604 = vmatpush.bf16.msra.mxu0 %v592_v19  ;;  %637 = vmatpush.bf16.msra.mxu1 %v595_v20  ;;  %v551_v20 = vld [vmem:[%s1747_s2 + $0x20] sm:$0xf] }
  0x35   : > { %877 = vperm.xlu1 %1326, %v867_v16   ;;  %872 = vperm.xlu0 %1325, %v866_v22  }
  0x37   : > { %1217 = vmatmul.msk.bf16.vlgmr.msra.gmra.mxu0 %vm575_vm1, %v1258_v21  ;;  %1222 = vmatmul.msk.bf16.vlgmr.msra.gmra.mxu1 %vm575_vm1, %v1258_v21 }
  0x38   : > { %916 = vperm.xlu2 %1327, %v912_v34  }
  0x3d   : > { %921 = vperm.xlu1 %1326, %v913_v24  }
  0x47   : > { %1218 = vmatmul.msk.bf16.gmra.mxu0 %vm575_vm1, %v1259_v25  ;;  %1223 = vmatmul.msk.bf16.gmra.mxu1 %vm575_vm1, %v1259_v25 }
  0x57   : > { %1219 = vmatmul.msk.bf16.gmra.mxu0 %vm575_vm1, %v1260_v26  ;;  %1224 = vmatmul.msk.bf16.gmra.mxu1 %vm575_vm1, %v1260_v26  ;;  %v569_v26 = vunpack.c.l.b16 %v551_v20 }
  0x67   : > { %1225 = vmatmul.msk.bf16.gmra.mxu1 %vm575_vm1, %v1261_v13  ;;  %1220 = vmatmul.msk.bf16.gmra.mxu0 %vm575_vm1, %v1261_v13 }
  0x79   : > { %v722_v0 = vpop.permute.xlu2 %721 }
  0x81   : > { %v667_v18 = vpop.permute.xlu2 %666 }
  0x8f   : > { %v678_v35 = vpop.permute.xlu1 %677  ;;  %v688_v36 = vpop.permute.xlu0 %687 }
  0x97   : > { %v683_v39 = vpop.permute.xlu1 %682  ;;  %v693_v40 = vpop.permute.xlu0 %692 }
  0xb4   : > { %v1616_v27 = vpop.f32.mrf.mxu0  ;;  %v1618_v28 = vpop.f32.mrf.mxu1 }
  0xb5   : > { %v669_v22 = vadd.f32 %v667_v18, %v1616_v27  ;;  %v670_v23 = vadd.f32 %v667_v18, %v1618_v28 }
  0xbc   : > { %v608_v29 = vpop.f32.mrf.mxu0  ;;  %v641_v30 = vpop.f32.mrf.mxu1 }
  0xbd   : > { %v695_v49 = vadd.f32 %v678_v35, %v608_v29  ;;  %v696_v50 = vadd.f32 %v678_v35, %v641_v30 }
  0xbf   : > { %v703_v59 = vmax.f32 %v695_v49, 0.0  ;;  %v704_v60 = vmax.f32 %v696_v50, 0.0 }
  0xc4   : > { %v611_v32 = vpop.f32.mrf.mxu0  ;;  %v644_v33 = vpop.f32.mrf.mxu1 }
  0xc5   : > { %v697_v45 = vadd.f32 %v683_v39, %v611_v32  ;;  %v698_v46 = vadd.f32 %v683_v39, %v644_v33  ;;  %v727_v33 = vpop.permute.xlu0 %726 }
  0xc7   : > { %v705_v55 = vmax.f32 %v697_v45, 0.0  ;;  %v706_v56 = vmax.f32 %v698_v46, 0.0 }
  0xc9   : > { %v713_v61 = vpack.c.bf16 %v705_v55, %v703_v59  ;;  %v714_v62 = vpack.c.bf16 %v706_v56, %v704_v60 }
  0xcc   : > { %v613_v37 = vpop.f32.mrf.mxu0  ;;  %v646_v38 = vpop.f32.mrf.mxu1 }
  0xcd   : > { %v699_v41 = vadd.f32 %v688_v36, %v613_v37  ;;  %v700_v42 = vadd.f32 %v688_v36, %v646_v38  ;;  %v574_v38 = vpack.c.b16 %v569_v26, %v569_v26  ;;  %v873_v20 = vpop.permute.xlu0 %872 }
  0xcf   : > { %v707_v51 = vmax.f32 %v699_v41, 0.0  ;;  %v708_v52 = vmax.f32 %v700_v42, 0.0  ;;  %1226 = vmatmul.msk.bf16.gmra.mxu1 %vm575_vm1, %v574_v38  ;;  %1221 = vmatmul.msk.bf16.gmra.mxu0 %vm575_vm1, %v574_v38 }
  0xd4   : > { %v616_v43 = vpop.f32.mrf.mxu0  ;;  %v649_v44 = vpop.f32.mrf.mxu1 }
  0xd5   : > { %v701_v47 = vadd.f32 %v693_v40, %v616_v43  ;;  %v702_v48 = vadd.f32 %v693_v40, %v649_v44 }
  0xd7   : > { %v709_v53 = vmax.f32 %v701_v47, 0.0  ;;  %v710_v54 = vmax.f32 %v702_v48, 0.0 }
  0xd9   : > { %v715_v57 = vpack.c.bf16 %v709_v53, %v707_v51  ;;  %v716_v58 = vpack.c.bf16 %v710_v54, %v708_v52  ;;  %v1263_v52 = vld [vmem:[%s1726_s7] sm:$0xff]  ;;  %v1264_v54 = vld [vmem:[%s1726_s7 + $0x8] sm:$0xff] }
  0xdb   : > { %744 = vmatpush.bf16.msra.mxu2 %v715_v57  ;;  %758 = vmatpush.bf16.msra.mxu3 %v716_v58 }
  0xdc   : > { %v651_v55 = vpop.f32.mrf.mxu1  ;;  %v618_v56 = vpop.f32.mrf.mxu0 }
  0xdf   : > { %745 = vmatpush.bf16.msra.mxu2 %v713_v61  ;;  %759 = vmatpush.bf16.msra.mxu3 %v714_v62 }
  0xe2   : > { %1231 = vmatmul.msk.bf16.vlgmr.msra.gmra.mxu2 %vm734_vm2, %v1262_v63  ;;  %1232 = vmatmul.msk.bf16.vlgmr.msra.gmra.mxu3 %vm734_vm2, %v1262_v63 }
  0xe4   : > { %v654_v57 = vpop.f32.mrf.mxu1  ;;  %v621_v58 = vpop.f32.mrf.mxu0 }
  0xec   : > { %v656_v59 = vpop.f32.mrf.mxu1  ;;  %v623_v60 = vpop.f32.mrf.mxu0 }
 0x14c   : > { %v659_v61 = vpop.f32.mrf.mxu1  ;;  %v626_v62 = vpop.f32.mrf.mxu0 }
 0x154   : > { %v661_v63 = vpop.f32.mrf.mxu1 }
 0x165   : > { %v747_v1 = vpop.f32.mrf.mxu2  ;;  %v761_v2 = vpop.f32.mrf.mxu3 }
 0x166   : > { %v748_v3 = vadd.f32 %v747_v1, %v722_v0  ;;  %v762_v4 = vadd.f32 %v761_v2, %v722_v0  ;;  %v628_v0 = vpop.f32.mrf.mxu0 }
 0x168   : > { %v766_v5 = vadd.f32 2.0, %v748_v3  ;;  %v767_v6 = vadd.f32 2.0, %v762_v4 }
 0x16a   : > { %v768_v7 = vand.u32 2147483647, %v766_v5  ;;  %v769_v8 = vand.u32 2147483647, %v767_v6  ;;  %vm780_vm3 = vcmp.ge.f32.partialorder %v766_v5, 0.0  ;;  %v786_v30 = vmin.f32 %v766_v5, 0.0  ;;  %v883_v5 = vpop.permute.xlu1 %882 }
 0x16b   : > { %vm781_vm4 = vcmp.ge.f32.partialorder %v767_v6, 0.0  ;;  %v787_v34 = vmin.f32 %v767_v6, 0.0 }
 0x16c   : > { %v770_v9 = vsub.f32 0.0, %v768_v7  ;;  %v771_v10 = vsub.f32 0.0, %v769_v8 }
 0x16d   : > { %v749_v24 = vpop.f32.mrf.mxu2  ;;  %v763_v36 = vpop.f32.mrf.mxu3 }
 0x16e   : > { %v772_v11 = vmul.f32 1.442695, %v770_v9  ;;  %v774_v12 = vmul.f32 1.442695, %v771_v10  ;;  %v750_v27 = vadd.f32 %v749_v24, %v727_v33  ;;  %v764_v44 = vadd.f32 %v763_v36, %v727_v33 }
 0x170   : > { %1328 = vpow2.f32 %v772_v11 }
 0x171   : > { %1330 = vpow2.f32 %v774_v12 }
 0x172   : > { %v878_v13 = vpop.permute.xlu1 %877 }
 0x176   : > { %v1329_v14 = vpop.eup %1328 }
 0x177   : > { %v1331_v15 = vpop.eup %1330  ;;  %v776_v16 = vadd.f32 1.0, %v1329_v14 }
 0x178   : > { %v777_v17 = vadd.f32 1.0, %v1331_v15 }
 0x179   : > { %1332 = vrcp.f32 %v776_v16 }
 0x17a   : > { %1334 = vlog2.f32 %v776_v16 }
 0x17b   : > { %1336 = vrcp.f32 %v777_v17 }
 0x17c   : > { %1338 = vlog2.f32 %v777_v17  ;;  %v888_v17 = vpop.permute.xlu2 %887 }
 0x17f   : > { %v1333_v19 = vpop.eup %1332 }
 0x180   : > { %v1335_v21 = vpop.eup %1334  ;;  %v782_v25 = vmul.f32 %v1333_v19, %v1329_v14 }
 0x181   : > { %v1337_v29 = vpop.eup %1336  ;;  %v789_v31 = vmul.f32 0.6931472, %v1335_v21 }
 0x182   : > { %v1339_v32 = vpop.eup %1338  ;;  %v784_v35 = vsel %vm780_vm3, %v1333_v19, %v782_v25  ;;  %v783_v37 = vmul.f32 %v1337_v29, %v1331_v15 }
 0x183   : > { %v792_v39 = vsub.f32 %v786_v30, %v789_v31  ;;  %v791_v40 = vmul.f32 0.6931472, %v1339_v32  ;;  %v794_v41 = vmul.f32 %v784_v35, %v669_v22 }
 0x184   : > { %v785_v28 = vsel %vm781_vm4, %v1337_v29, %v783_v37 }
 0x185   : > { %v793_v42 = vsub.f32 %v787_v34, %v791_v40  ;;  %v1643_v43 = vadd.f32 %v794_v41, %v750_v27  ;;  %v795_v45 = vmul.f32 %v785_v28, %v670_v23  ;;  %v1265_v41 = vld [vmem:[%s1728_s9] sm:$0xff] }
 0x187   : > { %v1006_v46 = vrot.slane %v793_v42, 4  ;;  %v1645_v47 = vadd.f32 %v795_v45, %v764_v44  ;;  %v802_v48 = vpack.c.bf16 %v1643_v43, %v1643_v43  ;;  %v917_v42 = vpop.permute.xlu2 %916 }
 0x189   : > { %v1650_v49 = vsel %vm538_vm0, %v792_v39, %v1006_v46  ;;  %v823_v50 = vsel %vm821_vm5, %v802_v48, 0  ;;  %v803_v51 = vpack.c.bf16 %v1645_v47, %v1645_v47 }
 0x18a   : > { %835 = vmatpush.bf16.msrb.mxu2 %v823_v50 }
 0x18b   : > { %v826_v53 = vsel %vm821_vm5, %v803_v51, 0 }
 0x18c   : > { %854 = vmatpush.bf16.msrb.mxu3 %v826_v53 }
 0x18d   : > { %1241 = vmatmul.msk.bf16.vlgmr.msrb.gmra.mxu2 %vm814_vm6, %v1263_v52 }
 0x18f   : > { %1243 = vmatmul.msk.bf16.vlgmr.msrb.gmra.mxu3 %vm814_vm6, %v1263_v52 }
 0x19d   : > { %1242 = vmatmul.msk.bf16.gmra.mxu2 %vm814_vm6, %v1264_v54 }
 0x19f   : > { %1244 = vmatmul.msk.bf16.gmra.mxu3 %vm814_vm6, %v1264_v54 }
 0x210   : > { %v837_v1 = vpop.f32.mrf.mxu2 }
 0x211   : > { %v838_v11 = vadd.f32 %v837_v1, %v618_v56 }
 0x212   : > { %v856_v2 = vpop.f32.mrf.mxu3 }
 0x213   : > { %v857_v18 = vadd.f32 %v856_v2, %v651_v55  ;;  %v890_v25 = vadd.f32 %v873_v20, %v838_v11  ;;  %v922_v11 = vpop.permute.xlu1 %921 }
 0x215   : > { %v891_v32 = vadd.f32 %v873_v20, %v857_v18  ;;  %v898_v37 = vmax.f32 %v890_v25, 0.0 }
 0x217   : > { %v899_v40 = vmax.f32 %v891_v32, 0.0 }
 0x218   : > { %v839_v3 = vpop.f32.mrf.mxu2 }
 0x219   : > { %v840_v9 = vadd.f32 %v839_v3, %v621_v58 }
 0x21a   : > { %v858_v4 = vpop.f32.mrf.mxu3 }
 0x21b   : > { %v859_v14 = vadd.f32 %v858_v4, %v654_v57  ;;  %v892_v21 = vadd.f32 %v878_v13, %v840_v9 }
 0x21d   : > { %v893_v26 = vadd.f32 %v878_v13, %v859_v14  ;;  %v900_v33 = vmax.f32 %v892_v21, 0.0 }
 0x21f   : > { %v901_v38 = vmax.f32 %v893_v26, 0.0  ;;  %v908_v27 = vpack.c.bf16 %v900_v33, %v898_v37 }
 0x220   : > { %v842_v6 = vpop.f32.mrf.mxu2 }
 0x221   : > { %v843_v8 = vadd.f32 %v842_v6, %v623_v60  ;;  %v909_v28 = vpack.c.bf16 %v901_v38, %v899_v40 }
 0x222   : > { %v861_v7 = vpop.f32.mrf.mxu3 }
 0x223   : > { %v862_v10 = vadd.f32 %v861_v7, %v656_v59  ;;  %v894_v15 = vadd.f32 %v883_v5, %v843_v8 }
 0x225   : > { %v895_v22 = vadd.f32 %v883_v5, %v862_v10  ;;  %v902_v29 = vmax.f32 %v894_v15, 0.0 }
 0x227   : > { %v903_v34 = vmax.f32 %v895_v22, 0.0 }
 0x228   : > { %v844_v12 = vpop.f32.mrf.mxu2 }
 0x229   : > { %v845_v16 = vadd.f32 %v844_v12, %v626_v62  ;;  %v988_v62 = vlaneseq }
 0x22a   : > { %v863_v19 = vpop.f32.mrf.mxu3 }
 0x22b   : > { %v896_v23 = vadd.f32 %v888_v17, %v845_v16  ;;  %v864_v24 = vadd.f32 %v863_v19, %v659_v61  ;;  %v989_v1 = vshrl.u32 %v988_v62, 7 }
 0x22d   : > { %v904_v30 = vmax.f32 %v896_v23, 0.0  ;;  %v897_v31 = vadd.f32 %v888_v17, %v864_v24  ;;  %vm990_vm9 = vcmp.ge.s32.totalorder %v989_v1, 2 }
 0x22f   : > { %v910_v35 = vpack.c.bf16 %v904_v30, %v902_v29  ;;  %v905_v36 = vmax.f32 %v897_v31, 0.0 }
 0x231   : > { %v911_v39 = vpack.c.bf16 %v905_v36, %v903_v34  ;;  %938 = vmatpush.bf16.msra.mxu2 %v910_v35 }
 0x233   : > { %952 = vmatpush.bf16.msra.mxu3 %v911_v39 }
 0x235   : > { %939 = vmatpush.bf16.msra.mxu2 %v908_v27 }
 0x237   : > { %953 = vmatpush.bf16.msra.mxu3 %v909_v28 }
 0x238   : > { %1249 = vmatmul.msk.bf16.vlgmr.msra.gmra.mxu2 %vm734_vm2, %v1265_v41 }
 0x23a   : > { %1250 = vmatmul.msk.bf16.vlgmr.msra.gmra.mxu3 %vm734_vm2, %v1265_v41 }
 0x2bb   : > { %v941_v44 = vpop.f32.mrf.mxu2 }
 0x2bc   : > { %v942_v45 = vadd.f32 %v941_v44, %v917_v42 }
 0x2bd   : > { %v955_v46 = vpop.f32.mrf.mxu3 }
 0x2be   : > { %v960_v48 = vadd.f32 2.0, %v942_v45  ;;  %v956_v50 = vadd.f32 %v955_v46, %v917_v42 }
 0x2c0   : > { %v962_v51 = vand.u32 2147483647, %v960_v48  ;;  %v961_v52 = vadd.f32 2.0, %v956_v50  ;;  %vm974_vm7 = vcmp.ge.f32.partialorder %v960_v48, 0.0  ;;  %v980_v7 = vmin.f32 %v960_v48, 0.0 }
 0x2c2   : > { %v964_v53 = vsub.f32 0.0, %v962_v51  ;;  %v963_v54 = vand.u32 2147483647, %v961_v52  ;;  %vm975_vm8 = vcmp.ge.f32.partialorder %v961_v52, 0.0  ;;  %v981_v12 = vmin.f32 %v961_v52, 0.0 }
 0x2c3   : > { %v943_v5 = vpop.f32.mrf.mxu2 }
 0x2c4   : > { %v966_v55 = vmul.f32 1.442695, %v964_v53  ;;  %v965_v56 = vsub.f32 0.0, %v963_v54  ;;  %v944_v15 = vadd.f32 %v943_v5, %v922_v11 }
 0x2c5   : > { %v957_v9 = vpop.f32.mrf.mxu3 }
 0x2c6   : > { %1340 = vpow2.f32 %v966_v55  ;;  %v968_v57 = vmul.f32 1.442695, %v965_v56  ;;  %v958_v19 = vadd.f32 %v957_v9, %v922_v11 }
 0x2c8   : > { %1342 = vpow2.f32 %v968_v57 }
 0x2cc   : > { %v1341_v58 = vpop.eup %1340 }
 0x2cd   : > { %v970_v59 = vadd.f32 1.0, %v1341_v58 }
 0x2ce   : > { %v1343_v60 = vpop.eup %1342 }
 0x2cf   : > { %1344 = vrcp.f32 %v970_v59  ;;  %v971_v61 = vadd.f32 1.0, %v1343_v60 }
 0x2d0   : > { %1346 = vlog2.f32 %v970_v59 }
 0x2d1   : > { %1348 = vrcp.f32 %v971_v61 }
 0x2d2   : > { %1350 = vlog2.f32 %v971_v61 }
 0x2d5   : > { %v1345_v63 = vpop.eup %1344 }
 0x2d6   : > { %v1347_v0 = vpop.eup %1346  ;;  %v976_v2 = vmul.f32 %v1345_v63, %v1341_v58 }
 0x2d7   : > { %v1349_v3 = vpop.eup %1348  ;;  %v983_v4 = vmul.f32 0.6931472, %v1347_v0 }
 0x2d8   : > { %v1351_v6 = vpop.eup %1350  ;;  %v978_v8 = vsel %vm974_vm7, %v1345_v63, %v976_v2  ;;  %v977_v10 = vmul.f32 %v1349_v3, %v1343_v60 }
 0x2d9   : > { %v985_v13 = vmul.f32 0.6931472, %v1351_v6  ;;  %v991_v14 = vmul.f32 %v978_v8, %v1643_v43  ;;  %v986_v17 = vsub.f32 %v980_v7, %v983_v4 }
 0x2da   : > { %v979_v16 = vsel %vm975_vm8, %v1349_v3, %v977_v10 }
 0x2db   : > { %v987_v18 = vsub.f32 %v981_v12, %v985_v13  ;;  %v992_v20 = vmul.f32 %v979_v16, %v1645_v47  ;;  %v993_v22 = vadd.f32 %v991_v14, %v944_v15  ;;  %v1010_v25 = vsel %vm990_vm9, %v986_v17, 0.0 }
 0x2dd   : > { %v1011_v21 = vsel %vm990_vm9, %v987_v18, 0.0  ;;  %v994_v23 = vadd.f32 %v992_v20, %v958_v19  ;;  %v995_v32 = vsel %vm990_vm9, %v993_v22, %v1643_v43 }
 0x2de   : > { %v1014_v24 = vrot.slane %v1011_v21, 4 }
 0x2df   : > { %v996_v26 = vsel %vm990_vm9, %v994_v23, %v1645_v47 }
 0x2e0   : > { %v1015_v29 = vsel %vm538_vm0, %v1010_v25, %v1014_v24  ;;  %v999_v30 = vrot.slane %v996_v26, 4 }
 0x2e1   : > { %v1017_v31 = vadd.f32 %v1015_v29, %v1650_v49 }
 0x2e2   : > { %v1000_v33 = vsel %vm538_vm0, %v995_v32, %v999_v30 }
 0x2e3   : > { %1024 = vst [vmem:[#allocation1] ss:$2 sm:$0xff] %v1017_v31 }
 0x2e4   : > { %1002 = vst [vmem:[%s479_s28] sm:$0xff] %v1000_v33 }
 0x2ea   : > { %v1025_v34 = vld.sshfl [vmem:[#allocation1] sm:$0xff pattern:$0x75316420]  ;;  %v1026_v35 = vld.sshfl [vmem:[#allocation1 + $0x8] sm:$0xff pattern:$0x75316420] }
 0x2eb   : > { %v1029_v36 = vsel %vm538_vm0, %v1025_v34, 0.0  ;;  %v1030_v47 = vsel %vm538_vm0, %v1026_v35, 0.0 }
 0x2ec   : > { %v1031_v37 = vadd.f32 %v1030_v47, %v1029_v36 }
 0x2ee   : > { %1032 = vadd.xlane.f32.xlu0 %v1031_v37 }
 0x2ef   : > { %1379 = shalt.err (!%p1376_p5)
}
 0x2f0   : > { %1269 = dma.vmem_to_hbm [thread:$0]  (%p1538_p4), %s1067_s20, 128, %s1069_s30, %s1046_s29   ;;  %vm1043_vm10 = vcmask 0  }
 0x2f1   : > { %s515_s2 = scalar_lea.vmem %s1731_s12, %s1561_s27 }
 0x361   : > { %v1033_v43 = vpop.xlane.xlu0 %1032 }
 0x362   : > { %v1034_v49 = vrot.slane %v1033_v43, 4 }
 0x364   : > { %v1035_v38 = vadd.f32 %v1034_v49, %v1033_v43 }
 0x366   : > { %v1036_v39 = vrot.slane %v1035_v38, 2 }
 0x368   : > { %v1037_v40 = vadd.f32 %v1036_v39, %v1035_v38 }
 0x36a   : > { %v1038_v27 = vrot.slane %v1037_v40, 1 }
 0x36c   : > { %v1039_v41 = vadd.f32 %v1038_v27, %v1037_v40 }
 0x36e   : > { %1267 = vpush %v1039_v41 }
 0x39f   : > { %s1268_s3 = spop %1267 }
 0x3a0   : > { %v1041_v28 = vstv %s1268_s3 }
 0x3a1   : > { %1044 = vst.msk [vmem:[%s515_s2] sm:$0x1] %vm1043_vm10, %v1041_v28 }
 0x3a2 PF: > { %p1275_p4 = scmp.ge.s32.totalorder %s1430_s26, 2  ;;  %s1084_s13 = sand.u32 1, %s1410_s21  }
 0x3a3   : > { %s1085_s17 = scalar_lea.sflag [#allocation4], %s1084_s13 }
 0x3a4   : > { %p1272_p6 = pnand %p1275_p4, %p1545_p8 }
 0x3a6   : > { %p1273_p7 = pneg %p1272_p6 }
 0x3a8   : > { %1405 = dma.done.wait (%p1273_p7), %s1085_s17, 128  }
 0x3a9   : > { %1407 = vsyncadd (%p1273_p7), %s1085_s17, 4294967168  ;;  %s26_s26 = sadd.s32 1, %s1430_s26   ;;  %s1749_s27 = sld [smem:[#allocation6_spill]] }
 0x3aa   : > { %p23_p9 = scmp.ge.s32.totalorder %s26_s26, 4   ;;  %s1750_s23 = sld [smem:[#allocation9_spill]] }
 0x3ab   : > { %s1751_s24 = sld [smem:[#allocation7_spill]]  ;;  %s1753_s21 = smov %s1414_s22 }
 0x3ac   : > { %s1752_s25 = sld [smem:[#allocation8_spill]]  ;;  %25 = sbr.rel (!%p23_p9) target bundleno = 9 (0x9), region = 123 }
 0x3af   : > { %s1754_s22 = smov %s1749_s27 }
 0x3b1   :  { %1098 = vsyncpa [#allocation4], 1 }
 0x3b2   :  { %1100 = vsyncpa [#allocation4 + $0x1], 1 }

</bundles_post_ra>
